<compile_context>
chip_gen: v7x
topology: tpu7x:2x2x1
jax: 0.10.0
libtpu: 0.0.40
codegen_flags: <defaults>
</compile_context>

<pallas_src>
import jax
import jax.numpy as jnp
from jax.experimental import pallas as pl
from jax.experimental.pallas import tpu as pltpu


def _round_up(x, m):
    return ((x + m - 1) // m) * m


def _pin(shape):
    zeros = (0,) * len(shape)
    return pl.BlockSpec(shape, lambda i, _z=zeros: _z)


def _rows(tm, *rest):
    zeros = (0,) * len(rest)
    return pl.BlockSpec((tm,) + tuple(rest), lambda i, _z=zeros: (i,) + _z)


# ---------------------------------------------------------------------------
# Kernel 1: SAGEConv1   h1 = relu( A @ (x0 @ w1l) + (x0 @ w1r) + b1 )
# The K=3 projections of x0 are hoisted to XLA, so the only in-kernel matmul
# is one lane-dense bf16 aggregation per row tile.
# ---------------------------------------------------------------------------
def _conv1_kernel(a_ref, p1l_ref, p1r_ref, b1_ref, h1_ref):
    agg = jnp.dot(a_ref[...], p1l_ref[...], preferred_element_type=jnp.float32)
    h1_ref[...] = jnp.maximum(agg + p1r_ref[...] + b1_ref[...], 0.0)


# ---------------------------------------------------------------------------
# Kernel 2: SAGEConv2 + MLP head (ReLU, LayerNorm, final linear), row-tiled.
# ---------------------------------------------------------------------------
def _conv2_head_kernel(a_ref, h1b_ref, h1_ref, p3a_ref,
                       w2_ref, b2_ref, w3_ref, b3_ref,
                       ln_g_ref, ln_b_ref, w4_ref, b4_ref, out_ref):
    f32 = jnp.float32

    # mean aggregation of relu(x1) for this row tile (bf16 operands, f32 acc)
    agg1 = jnp.dot(a_ref[...], h1b_ref[...], preferred_element_type=f32)
    h1t = h1_ref[...]

    # SAGEConv2: [agg1 | h1] @ [[w2l],[w2r]]  -> one K=2H matmul, + b2
    x2 = jnp.dot(jnp.concatenate([agg1, h1t], axis=-1), w2_ref[...],
                 preferred_element_type=f32) + b2_ref[...]
    h2 = jnp.maximum(x2, 0.0)

    # head Linear on cat([x0, h1, h2]); the x0-part (p3a) is precomputed.
    z = (jnp.dot(jnp.concatenate([h1t, h2], axis=-1), w3_ref[...],
                 preferred_element_type=f32)
         + p3a_ref[...] + b3_ref[...])
    z = jnp.maximum(z, 0.0)

    # LayerNorm(n_hidden), eps=1e-5 (PyTorch default)
    mu = jnp.mean(z, axis=-1, keepdims=True)
    var = jnp.mean((z - mu) ** 2, axis=-1, keepdims=True)
    zn = (z - mu) * jax.lax.rsqrt(var + 1e-5) * ln_g_ref[...] + ln_b_ref[...]

    # final Linear; weights are lane-padded to 128 lanes -> unmasked stores.
    out_ref[...] = (jnp.dot(zn, w4_ref[...], preferred_element_type=f32)
                    + b4_ref[...])


# ---------------------------------------------------------------------------
# Plain-JAX glue shared by the Pallas path and the numerical reference.
# ---------------------------------------------------------------------------
def _prepare(x0, edge_index, params):
    f32, bf16 = jnp.float32, jnp.bfloat16
    n, n_in = x0.shape
    h = params["w1l"].shape[1]
    n_out2 = params["w4"].shape[1]

    n_pad = _round_up(n, 128)
    out_pad = _round_up(n_out2, 128)

    # dense row-normalized adjacency (mean aggregation, src -> dst), bf16.
    # TODO(synk): for large/sparse graphs replace this O(N^2) dense adjacency
    # with a scalar-prefetch CSR / padded-neighbor gather aggregation kernel.
    src, dst = edge_index[0], edge_index[1]
    adj = jnp.zeros((n_pad, n_pad), f32).at[dst, src].add(1.0)
    deg = jnp.clip(jnp.sum(adj, axis=1, keepdims=True), 1.0, None)
    a_bf16 = (adj / deg).astype(bf16)

    x0_pad = jnp.zeros((n_pad, n_in), f32).at[:n, :].set(x0)

    # the three K=n_in projections of x0 fused into ONE XLA matmul.
    w_x0 = jnp.concatenate([params["w1l"], params["w1r"], params["w3a"]], axis=1)
    p = x0_pad @ w_x0                       # (n_pad, 3h)
    p1l_bf16 = p[:, :h].astype(bf16)        # feeds A @ (x0 @ w1l)
    p1r = p[:, h:2 * h]                     # x0 @ w1r
    p3a = p[:, 2 * h:]                      # x0 @ w3a

    # stacked-contraction weights for conv2 and the head.
    w2 = jnp.concatenate([params["w2l"], params["w2r"]], axis=0)   # (2h, h)
    w3 = jnp.concatenate([params["w3b"], params["w3c"]], axis=0)   # (2h, h)

    # lane-pad the final projection so the kernel's output store is dense.
    w4p = jnp.zeros((h, out_pad), f32).at[:, :n_out2].set(params["w4"])
    b4p = jnp.zeros((1, out_pad), f32).at[:, :n_out2].set(params["b4"])

    return dict(a=a_bf16, p1l=p1l_bf16, p1r=p1r, p3a=p3a, w2=w2, w3=w3,
                w4=w4p, b4=b4p, n=n, n_pad=n_pad, h=h,
                n_out2=n_out2, out_pad=out_pad)


def sage_graph_conv_net(x0, edge_index, params, *, tm=128):
    """Pallas forward pass.  x0: (N, n_in) f32, edge_index: (2, E) int32."""
    prep = _prepare(x0, edge_index, params)
    n, n_pad, h = prep["n"], prep["n_pad"], prep["h"]
    n_out2, out_pad = prep["n_out2"], prep["out_pad"]
    f32 = jnp.float32

    # row tile: multiple of 16 (bf16 sublane packing), must divide n_pad.
    tm = _round_up(max(16, min(tm, n_pad)), 16)
    if n_pad % tm:
        tm = 128                      # 128 always divides n_pad
    grid = (n_pad // tm,)

    cparams = pltpu.CompilerParams(
        dimension_semantics=("parallel",),
        vmem_limit_bytes=32 * 1024 * 1024,
    )

    # ---- kernel 1: SAGEConv1 -------------------------------------------
    cost1 = pl.CostEstimate(
        flops=2 * n_pad * n_pad * h,
        transcendentals=0,
        bytes_accessed=2 * n_pad * n_pad + 2 * n_pad * h + 2 * 4 * n_pad * h,
    )
    h1 = pl.pallas_call(
        _conv1_kernel,
        out_shape=jax.ShapeDtypeStruct((n_pad, h), f32),
        grid=grid,
        in_specs=[
            _rows(tm, n_pad),        # A strip (bf16)
            _pin((n_pad, h)),        # p1l (bf16, full, pinned across tiles)
            _rows(tm, h),            # p1r tile (f32)
            _pin((1, h)),            # b1
        ],
        out_specs=_rows(tm, h),
        compiler_params=cparams,
        cost_estimate=cost1,
    )(prep["a"], prep["p1l"], prep["p1r"], params["b1"])

    h1_bf16 = h1.astype(jnp.bfloat16)   # one XLA cast, reused by every tile

    # ---- kernel 2: SAGEConv2 + MLP head ----------------------------------
    cost2 = pl.CostEstimate(
        flops=(2 * n_pad * n_pad * h + 2 * 2 * n_pad * (2 * h) * h
               + 2 * n_pad * h * out_pad),
        transcendentals=n_pad,
        bytes_accessed=(2 * n_pad * n_pad + 2 * n_pad * h + 2 * 4 * n_pad * h
                        + 4 * 4 * h * h + 4 * n_pad * out_pad),
    )
    out_padded = pl.pallas_call(
        _conv2_head_kernel,
        out_shape=jax.ShapeDtypeStruct((n_pad, out_pad), f32),
        grid=grid,
        in_specs=[
            _rows(tm, n_pad),        # A strip (bf16)
            _pin((n_pad, h)),        # h1 (bf16, full, pinned) for aggregation
            _rows(tm, h),            # h1 tile (f32) for the self path
            _rows(tm, h),            # p3a tile (x0 @ w3a, precomputed)
            _pin((2 * h, h)),        # stacked [w2l; w2r]
            _pin((1, h)),            # b2
            _pin((2 * h, h)),        # stacked [w3b; w3c]
            _pin((1, h)),            # b3
            _pin((1, h)),            # ln_g
            _pin((1, h)),            # ln_b
            _pin((h, out_pad)),      # w4 (lane-padded)
            _pin((1, out_pad)),      # b4 (lane-padded)
        ],
        out_specs=_rows(tm, out_pad),
        compiler_params=cparams,
        cost_estimate=cost2,
    )(prep["a"], h1_bf16, h1, prep["p3a"], prep["w2"], params["b2"],
      prep["w3"], params["b3"], params["ln_g"], params["ln_b"],
      prep["w4"], prep["b4"])

    return out_padded[:n, :n_out2]


def init_params(key, n_in=3, n_hidden=256, n_out=1):
    ks = jax.random.split(key, 8)
    s = lambda fan_in: 1.0 / jnp.sqrt(jnp.float32(fan_in))
    cat_dim = n_in + 2 * n_hidden
    return {
        # SAGEConv1
        "w1l": jax.random.normal(ks[0], (n_in, n_hidden), jnp.float32) * s(n_in),
        "b1": jnp.zeros((1, n_hidden), jnp.float32),
        "w1r": jax.random.normal(ks[1], (n_in, n_hidden), jnp.float32) * s(n_in),
        # SAGEConv2
        "w2l": jax.random.normal(ks[2], (n_hidden, n_hidden), jnp.float32) * s(n_hidden),
        "b2": jnp.zeros((1, n_hidden), jnp.float32),
        "w2r": jax.random.normal(ks[3], (n_hidden, n_hidden), jnp.float32) * s(n_hidden),
        # MLP Linear(cat_dim -> n_hidden), split along the concat axis
        "w3a": jax.random.normal(ks[4], (n_in, n_hidden), jnp.float32) * s(cat_dim),
        "w3b": jax.random.normal(ks[5], (n_hidden, n_hidden), jnp.float32) * s(cat_dim),
        "w3c": jax.random.normal(ks[6], (n_hidden, n_hidden), jnp.float32) * s(cat_dim),
        "b3": jnp.zeros((1, n_hidden), jnp.float32),
        # LayerNorm(n_hidden)
        "ln_g": jnp.ones((1, n_hidden), jnp.float32),
        "ln_b": jnp.zeros((1, n_hidden), jnp.float32),
        # MLP Linear(n_hidden -> 2*n_out)
        "w4": jax.random.normal(ks[7], (n_hidden, 2 * n_out), jnp.float32) * s(n_hidden),
        "b4": jnp.zeros((1, 2 * n_out), jnp.float32),
    }


def _reference(x0, edge_index, params):
    """Pure-JAX reference mirroring the kernel's bf16-aggregation numerics."""
    f32 = jnp.float32
    prep = _prepare(x0, edge_index, params)
    a = prep["a"]
    h1 = jnp.maximum(jnp.dot(a, prep["p1l"], preferred_element_type=f32)
                     + prep["p1r"] + params["b1"], 0.0)
    h1b = h1.astype(jnp.bfloat16)
    agg1 = jnp.dot(a, h1b, preferred_element_type=f32)
    x2 = jnp.concatenate([agg1, h1], -1) @ prep["w2"] + params["b2"]
    h2 = jnp.maximum(x2, 0.0)
    z = (jnp.concatenate([h1, h2], -1) @ prep["w3"]
         + prep["p3a"] + params["b3"])
    z = jnp.maximum(z, 0.0)
    mu = jnp.mean(z, -1, keepdims=True)
    var = jnp.mean((z - mu) ** 2, -1, keepdims=True)
    zn = (z - mu) * jax.lax.rsqrt(var + 1e-5) * params["ln_g"] + params["ln_b"]
    out = zn @ prep["w4"] + prep["b4"]
    return out[:prep["n"], :prep["n_out2"]]


if __name__ == "__main__":
    key = jax.random.PRNGKey(0)
    k_x, k_e, k_p = jax.random.split(key, 3)

    N, E = 48, 160
    n_in, n_hidden, n_out = 3, 128, 1

    x0 = jax.random.normal(k_x, (N, n_in), jnp.float32)
    edge_index = jax.random.randint(k_e, (2, E), 0, N, dtype=jnp.int32)
    params = init_params(k_p, n_in=n_in, n_hidden=n_hidden, n_out=n_out)

    out = sage_graph_conv_net(x0, edge_index, params, tm=32)  # grid of 4 tiles
    out = jax.block_until_ready(out)

    ref = _reference(x0, edge_index, params)
    assert out.shape == (N, 2 * n_out)
    err = float(jnp.max(jnp.abs(out - ref)))
    assert jnp.allclose(out, ref, atol=2e-3, rtol=2e-3), err

    print("KERNEL_OK")
</pallas_src>

<mosaic_0001>
module attributes {stable_mosaic.version = 11 : i64} {
  func.func @_conv1_kernel(%arg0: i32, %arg1: memref<32x128xbf16, #tpu.memory_space<vmem>>, %arg2: memref<128x128xbf16, #tpu.memory_space<vmem>>, %arg3: memref<32x128xf32, #tpu.memory_space<vmem>>, %arg4: memref<1x128xf32, #tpu.memory_space<vmem>>, %arg5: memref<32x128xf32, #tpu.memory_space<vmem>>) attributes {dimension_semantics = [#tpu.dimension_semantics<parallel>], iteration_bounds = array<i64: 4>, scalar_prefetch = 0 : i64, scratch_operands = 0 : i64, tpu.core_type = #tpu.core_type<tc>, window_params = [{transform_indices = @transform_0, window_bounds = array<i64: 32, 128>}, {pipeline_mode = #tpu.pipeline_mode<synchronous>, transform_indices = @transform_1, window_bounds = array<i64: 128, 128>}, {transform_indices = @transform_2, window_bounds = array<i64: 32, 128>}, {pipeline_mode = #tpu.pipeline_mode<synchronous>, transform_indices = @transform_3, window_bounds = array<i64: 1, 128>}, {transform_indices = @transform_4, window_bounds = array<i64: 32, 128>}]} {
    %c0 = arith.constant 0 : index
    %c0_0 = arith.constant 0 : index
    %0 = vector.load %arg1[%c0, %c0_0] : memref<32x128xbf16, #tpu.memory_space<vmem>>, vector<32x128xbf16>
    %c0_1 = arith.constant 0 : index
    %c0_2 = arith.constant 0 : index
    %1 = vector.load %arg2[%c0_1, %c0_2] : memref<128x128xbf16, #tpu.memory_space<vmem>>, vector<128x128xbf16>
    %cst = arith.constant dense<0.000000e+00> : vector<32x128xf32>
    %2 = tpu.matmul %0, %1, %cst {dimension_numbers = #tpu.dot_dimension_numbers<[1], [0], [0], [1], [0, 0, 1, 1], [], []>} : vector<32x128xbf16>, vector<128x128xbf16>, vector<32x128xf32> -> vector<32x128xf32>
    %c0_3 = arith.constant 0 : index
    %c0_4 = arith.constant 0 : index
    %3 = vector.load %arg3[%c0_3, %c0_4] : memref<32x128xf32, #tpu.memory_space<vmem>>, vector<32x128xf32>
    %4 = arith.addf %2, %3 : vector<32x128xf32>
    %c0_5 = arith.constant 0 : index
    %c0_6 = arith.constant 0 : index
    %5 = vector.load %arg4[%c0_5, %c0_6] : memref<1x128xf32, #tpu.memory_space<vmem>>, vector<1x128xf32>
    %6 = vector.broadcast %5 : vector<1x128xf32> to vector<32x128xf32>
    %7 = arith.addf %4, %6 : vector<32x128xf32>
    %cst_7 = arith.constant 0.000000e+00 : f32
    %8 = vector.broadcast %cst_7 : f32 to vector<32x128xf32>
    %9 = arith.maximumf %7, %8 : vector<32x128xf32>
    %c0_8 = arith.constant 0 : index
    %c0_9 = arith.constant 0 : index
    %10 = vector.load %arg5[%c0_8, %c0_9] : memref<32x128xf32, #tpu.memory_space<vmem>>, vector<32x128xf32>
    tpu.vector_store %arg5[%c0_8, %c0_9], %9 {strides = array<i32>} : memref<32x128xf32, #tpu.memory_space<vmem>>, vector<32x128xf32>,
    return
  }
  func.func @transform_0(%arg0: i32) -> (i32, i32) {
    %c0_i32 = arith.constant 0 : i32
    %c0_i32_0 = arith.constant 0 : i32
    return %arg0, %c0_i32 : i32, i32
  }
  func.func @transform_1(%arg0: i32) -> (i32, i32) {
    %c0_i32 = arith.constant 0 : i32
    %c0_i32_0 = arith.constant 0 : i32
    %c0_i32_1 = arith.constant 0 : i32
    return %c0_i32, %c0_i32_0 : i32, i32
  }
  func.func @transform_2(%arg0: i32) -> (i32, i32) {
    %c0_i32 = arith.constant 0 : i32
    %c0_i32_0 = arith.constant 0 : i32
    return %arg0, %c0_i32 : i32, i32
  }
  func.func @transform_3(%arg0: i32) -> (i32, i32) {
    %c0_i32 = arith.constant 0 : i32
    %c0_i32_0 = arith.constant 0 : i32
    %c0_i32_1 = arith.constant 0 : i32
    return %c0_i32, %c0_i32_0 : i32, i32
  }
  func.func @transform_4(%arg0: i32) -> (i32, i32) {
    %c0_i32 = arith.constant 0 : i32
    %c0_i32_0 = arith.constant 0 : i32
    return %arg0, %c0_i32 : i32, i32
  }
}

</mosaic_0001>

<bundles_post_ra>
// kernel: tpu_custom_call.1
= control target key start
LH: loop header
LB: loop body
LE: loop exit
PB: predicated region body
PF: predicated region fallthrough
CT: control target
= control target key end

     0   :  { %s1149_s0 = inlined_call_operand.hbm [shape: bf16[128,128], index: 0, kind: input, shape index: {}]   ;;  %s1150_s1 = inlined_call_operand.hbm [shape: bf16[128,128], index: 1, kind: input, shape index: {}]   ;;  %s1151_s2 = inlined_call_operand.hbm [shape: f32[128,128], index: 2, kind: input, shape index: {}]   ;;  %s1152_s3 = inlined_call_operand.vmem [shape: f32[1,128], index: 3, kind: input, shape index: {}]   ;;  %s1153_s4 = inlined_call_operand.hbm [shape: f32[128,128], index: 4, kind: output, shape index: {}]  }
   0x1   :  { %1160 = sst [smem:[#allocation13_spill]] %s1149_s0 }
   0x2   :  { %9 = vsyncpa [#allocation3], 0 }
   0x3   :  { %11 = vsyncpa [#allocation3 + $0x1], 0 }
   0x4   :  { %12 = vsyncpa [#allocation6], 0 }
   0x5   :  { %13 = vsyncpa [#allocation4], 0 }
   0x6   :  { %15 = vsyncpa [#allocation4 + $0x1], 0  ;;  %s882_s15 = smov 0   ;;  %s884_s16 = smov 0  }
   0x7   :  { %s886_s17 = smov 0   ;;  %s888_s18 = smov 0  }
   0x8 LB: > { %s903_s19 = sadd.s32 1, %s845_s18   ;;  %s28_s20 = sadd.s32 1, %s841_s17  ;;  %s845_s18 = sphi %s888_s18, %s1179_s18   ;;  %s841_s17 = sphi %s886_s17, %s1178_s17   ;;  %s837_s16 = sphi %s884_s16, %s1177_s16   ;;  %s833_s15 = sphi %s882_s15, %s1176_s15  }
   0x9   : > { %s25_s21 = ssub.s32 %s845_s18, %s903_s19  ;;  %p35_p0 = scmp.ne.s32.totalorder %s841_s17, %s837_s16 }
   0xa   : > { %p26_p1 = scmp.eq.s32.totalorder %s25_s21, 0  ;;  %p36_p2 = scmp.eq.s32.totalorder %s845_s18, 0 }
   0xb   : > { %p631_p4 = scmp.lt.s32.totalorder %s845_s18, 4  ;;  %s175_s23 = sand.u32 1, %s845_s18  }
   0xc   : > { %s912_s22 = scalar_select %p26_p1, %s841_s17, %s28_s20  }
   0xd   : > { %p37_p3 = por %p36_p2, %p35_p0  ;;  %s177_s24 = sand.u32 1, %s841_s17  }
   0xe   : > { %s545_s25 = sshll.u32 %s177_s24, 4  ;;  %s572_s26 = sshll.u32 %s845_s18, 8 }
   0xf   : > { %s1161_s0 = sld [smem:[#allocation13_spill]]  ;;  %s179_s30 = scalar_lea.vmem [#allocation2], %s545_s25 }
  0x10   : > { %s186_s5 = sshll.u32 %s179_s30, 4  ;;  %p926_p5 = pnand %p631_p4, %p37_p3  ;;  %s930_s5 = int_to_ptr.vmem [resolvable:$true] %s186_s5 }
  0x11   : > { %s932_s7 = sshll.u32 %s177_s24, 5  ;;  %s934_s8 = scalar_lea.sflag [#allocation3], %s175_s23 }
  0x12   : > { %p685_p7 = pneg %p926_p5 }
  0x15   : > { %s924_s29 = scalar_lea.hbm %s1161_s0, %s572_s26  ;;  %s688_s12 = scalar_lea.hbm %s1161_s0, 1024 }
  0x16   : > { %s683_s9 = scalar_lea.hbm %s924_s29, 256  ;;  %p689_p10 = scmp.lt.u32.totalorder %s924_s29, %s1161_s0 }
  0x17   : > { %p684_p6 = scmp.ne.s32.totalorder %s924_s29, %s683_s9  ;;  %p690_p11 = scmp.lt.u32.totalorder %s688_s12, %s683_s9 }
  0x18   : > { %p692_p13 = scmp.lt.u32.totalorder %s683_s9, %s924_s29 }
  0x19   : > { %p686_p8 = pnand %p685_p7, %p684_p6  ;;  %p691_p12 = por %p690_p11, %p689_p10 }
  0x1b   : > { %p687_p9 = pneg %p686_p8  ;;  %p693_p1 = por %p692_p13, %p691_p12 }
  0x1d   : > { %p694_p2 = pnand %p693_p1, %p687_p9 }
  0x1f   : > { %697 = shalt.err (!%p694_p2)
}
  0x20   : > { %s698_s20 = scalar_lea.vmem %s930_s5, 256  ;;  %s847_s21 = smov [#allocation2]  }
  0x21   : > { %p699_p3 = scmp.ne.s32.totalorder %s930_s5, %s698_s20  ;;  %s703_s23 = sshll.u32 %s847_s21, 4  ;;  %s704_s23 = int_to_ptr.vmem [resolvable:$false] %s703_s23 }
  0x22   : > { %s705_s24 = scalar_lea.vmem %s704_s23, 512  ;;  %p706_p8 = scmp.lt.s32.totalorder %s930_s5, %s704_s23 }
  0x23   : > { %p701_p4 = pnand %p699_p3, %p685_p7  ;;  %p707_p10 = scmp.lt.s32.totalorder %s705_s24, %s698_s20 }
  0x25   : > { %p702_p6 = pneg %p701_p4  ;;  %p708_p11 = por %p707_p10, %p706_p8 }
  0x27   : > { %p709_p12 = pnand %p708_p11, %p702_p6 }
  0x29   : > { %712 = shalt.err (!%p709_p12)
}
  0x2a   : > { %s1158_s25 = smov 64   ;;  %s1159_s26 = smov 4  }
  0x2b   : > { %622 = dma.hbm_to_vmem [thread:$0]  (!%p926_p5), %s924_s29, 256, %s930_s5, %s934_s8, %s1158_s25, %s1158_s25, %s1159_s26  }
  0x2c   : > { %s200_s27 = scalar_lea.vmem [#allocation7], %s932_s7  ;;  %s967_s30 = sadd.s32 4294967295, %s845_s18  }
  0x2d   : > { %s207_s28 = sshll.u32 %s200_s27, 4  ;;  %s541_s9 = sadd.s32 4294967294, %s845_s18   ;;  %s1007_s28 = int_to_ptr.vmem [resolvable:$true] %s207_s28 }
  0x2e   : > { %p41_p9 = scmp.ne.s32.totalorder %s837_s16, %s833_s15  ;;  %p1154_p13 = scmp.eq.s32.totalorder %s967_s30, 0 }
  0x2f   : > { %p133_p1 = scmp.eq.s32.totalorder %s967_s30, 3  ;;  %p139_p2 = scmp.eq.s32.totalorder %s541_s9, 3 }
  0x30   : > { %p542_p3 = scmp.ge.s32.totalorder %s845_s18, 1  ;;  %p977_p4 = por %p1154_p13, %p41_p9 }
  0x31   : > { %p984_p6 = por %p133_p1, %p35_p0  ;;  %p988_p8 = por %p139_p2, %p41_p9 }
  0x32   : > { %s1163_s10 = scalar_select %p977_p4, 1, 0 }
  0x33   : > { %s1164_s29 = scalar_select %p984_p6, 1, 0 }
  0x34   : > { %s1165_s5 = scalar_select %p988_p8, 1, 0 }
  0x35   : > { %p146_p10 = scmp.lt.s32.totalorder %s845_s18, 5  ;;  %s850_s11 = smov [#allocation5]  }
  0x36   : > { %s158_s12 = sshll.u32 %s850_s11, 4  ;;  %s573_s13 = sshll.u32 %s845_s18, 9  ;;  %s997_s12 = int_to_ptr.vmem [resolvable:$true] %s158_s12 }
  0x37   : > { %p993_p11 = pnand %p542_p3, %p146_p10  ;;  %s1005_s21 = scalar_lea.hbm %s1151_s2, %s573_s13 }
  0x38   : > { %s713_s24 = scalar_lea.hbm %s1005_s21, 512  ;;  %s718_s11 = scalar_lea.hbm %s1151_s2, 2048 }
  0x39   : > { %s1166_s7 = scalar_select %p993_p11, 1, 0 }
  0x3a   : > { %p615_p0 = pneg %p993_p11  ;;  %p714_p9 = scmp.ne.s32.totalorder %s1005_s21, %s713_s24 }
  0x3b   : > { %p719_p3 = scmp.lt.u32.totalorder %s1005_s21, %s1151_s2  ;;  %p720_p10 = scmp.lt.u32.totalorder %s718_s11, %s713_s24 }
  0x3c   : > { %p1011_p12 = pnand %p615_p0, %p1154_p13  ;;  %p716_p1 = pnand %p714_p9, %p685_p7 }
  0x3d   : > { %p721_p8 = por %p720_p10, %p719_p3  ;;  %p722_p0 = scmp.lt.u32.totalorder %s713_s24, %s1005_s21 }
  0x3e   : > { %p717_p2 = pneg %p716_p1 }
  0x3f   : > { %p723_p13 = por %p722_p0, %p721_p8 }
  0x41   : > { %p724_p6 = pnand %p723_p13, %p717_p2 }
  0x43   : > { %727 = shalt.err (!%p724_p6)
}
  0x44   : > { %s728_s20 = scalar_lea.vmem %s1007_s28, 512  ;;  %s851_s27 = smov [#allocation7]  }
  0x45   : > { %p729_p9 = scmp.ne.s32.totalorder %s1007_s28, %s728_s20  ;;  %s733_s9 = sshll.u32 %s851_s27, 4  ;;  %s734_s9 = int_to_ptr.vmem [resolvable:$false] %s733_s9 }
  0x46   : > { %s735_s13 = scalar_lea.vmem %s734_s9, 1024  ;;  %p736_p11 = scmp.lt.s32.totalorder %s1007_s28, %s734_s9 }
  0x47   : > { %p731_p1 = pnand %p729_p9, %p685_p7  ;;  %p737_p3 = scmp.lt.s32.totalorder %s735_s13, %s728_s20 }
  0x49   : > { %p732_p4 = pneg %p731_p1  ;;  %p738_p10 = por %p737_p3, %p736_p11 }
  0x4b   : > { %p739_p8 = pnand %p738_p10, %p732_p4 }
  0x4d   : > { %742 = shalt.err (!%p739_p8)
}
  0x4e   : > { %s852_s24 = smov 128   ;;  %s853_s11 = smov 8  }
  0x4f   : > { %625 = dma.hbm_to_vmem [thread:$0]  (!%p926_p5), %s1005_s21, 512, %s1007_s28, %s934_s8, %s852_s24, %s852_s24, %s853_s11  }
  0x50   : > { %s743_s27 = scalar_lea.hbm %s1150_s1, 1024  ;;  %p745_p13 = pneg %p1011_p12 }
  0x51   : > { %p744_p7 = scmp.ne.s32.totalorder %s1150_s1, %s743_s27  ;;  %p750_p11 = scmp.lt.u32.totalorder %s743_s27, %s1150_s1 }
  0x53   : > { %p746_p4 = pnand %p745_p13, %p744_p7 }
  0x55   : > { %p747_p6 = pneg %p746_p4 }
  0x57   : > { %p752_p2 = pnand %p750_p11, %p747_p6 }
  0x59   : > { %755 = shalt.err (!%p752_p2)
}
  0x5a   : > { %s756_s6 = scalar_lea.vmem %s997_s12, 1024  ;;  %p764_p1 = scmp.lt.s32.totalorder %s997_s12, %s997_s12 }
  0x5b   : > { %p757_p5 = scmp.ne.s32.totalorder %s997_s12, %s756_s6  ;;  %p765_p3 = scmp.lt.s32.totalorder %s756_s6, %s756_s6 }
  0x5d   : > { %p759_p0 = pnand %p757_p5, %p745_p13  ;;  %p766_p10 = por %p765_p3, %p764_p1 }
  0x5f   : > { %p760_p9 = pneg %p759_p0 }
  0x61   : > { %p767_p8 = pnand %p766_p10, %p760_p9 }
  0x63   : > { %770 = shalt.err (!%p767_p8)
}
  0x64   : > { %s1168_s0 = smov 4   ;;  %s1169_s8 = smov 64  }
  0x65   : > { %618 = dma.hbm_to_vmem [thread:$0]  (!%p1011_p12), %s1150_s1, 1024, %s997_s12, [#allocation6], %s1169_s8, %s1169_s8, %s1168_s0  }
  0x66   : > { %p1170_p7 = scmp.ne.s32.totalorder %s1166_s7, 0 }
  0x67   : > { %s221_s28 = sand.u32 (!%p1170_p7), 1, %s967_s30   ;;  %s1067_s21 = sand.u32 (!%p1170_p7), 1, %s837_s16  }
  0x68   : > { %219 = sbr.rel (%p1170_p7) target bundleno = 387 (0x183), region = 36  ;;  %s552_s13 = sshll.u32 (!%p1170_p7), %s1067_s21, 4 }
  0x69   : > { %s222_s23 = scalar_lea.sflag (!%p1170_p7), [#allocation3], %s221_s28  ;;  %s1070_s24 = scalar_lea.vmem (!%p1170_p7), [#allocation2], %s552_s13 }
  0x6a   : > { %p1171_p13 = scmp.ne.s32.totalorder (!%p1170_p7), %s1163_s10, 0 }
  0x6f   : > { %816 = dma.done.wait (%p1171_p13), %s222_s23, 256  }
  0x70   : > { %818 = vsyncadd (%p1171_p13), %s222_s23, 4294967040  ;;  %p1172_p12 = scmp.eq.s32.totalorder %s967_s30, 0 }
  0x72   : > { %820 = dma.done.wait (%p1172_p12), [#allocation6], 1024   ;;  %p1173_p4 = pmov %p1172_p12 }
  0x73   : > { %s554_s7 = sshll.u32 %s1067_s21, 5 }
  0x74   : > { %822 = vsyncadd (%p1173_p4), [#allocation6], 4294966272  ;;  %s1083_s12 = scalar_lea.vmem [#allocation7], %s554_s7 }
  0x75   : > { %824 = dma.done.wait (%p1171_p13), %s222_s23, 512  }
  0x76   : > { %826 = vsyncadd (%p1171_p13), %s222_s23, 4294966784  ;;  %v673_v0 = vld [vmem:[#allocation5] sm:$0xff]   ;;  %v674_v1 = vld [vmem:[#allocation5 + $0x8] sm:$0xff]   ;;  %s267_s14 = scalar_lea.vmem [#allocation8], %s554_s7  ;;  %s574_s20 = sshll.u32 %s967_s30, 9 }
  0x77   : > { %585 = vmatprep.subr.bf16.mxu0 %v673_v0  ;;  %v675_v2 = vld [vmem:[#allocation5 + $0x10] sm:$0xff]   ;;  %v676_v3 = vld [vmem:[#allocation5 + $0x18] sm:$0xff]   ;;  %v677_v5 = vld [vmem:[#allocation5 + $0x20] sm:$0xff]   ;;  %s438_s27 = sshll.u32 %s267_s14, 4  ;;  %s1106_s0 = scalar_lea.hbm %s1153_s4, %s574_s20  ;;  %s1101_s27 = int_to_ptr.vmem [resolvable:$true] %s438_s27 }
  0x78   : > { %586 = vmatpush3.bf16.msra.mxu0 %v673_v0  ;;  %v681_v4 = vld [vmem:[%s1070_s24] sm:$0xff]   ;;  %v678_v6 = vld [vmem:[#allocation5 + $0x28] sm:$0xff]   ;;  %v680_v8 = vld [vmem:[#allocation5 + $0x38] sm:$0xff]   ;;  %s425_s30 = scalar_lea.sflag [#allocation4], %s1067_s21  ;;  %s771_s8 = scalar_lea.vmem %s1101_s27, 512 }
  0x79   : > { %587 = vmatprep.subr.bf16.mxu0 %v674_v1  ;;  %601 = vmatprep.mubr.bf16.mxu0 %v681_v4  ;;  %v679_v7 = vld [vmem:[#allocation5 + $0x30] sm:$0xff]   ;;  %v682_v9 = vld [vmem:[%s1070_s24 + $0x8] sm:$0xff]   ;;  %v292_v11 = vld [vmem:[%s1083_s12] sm:$0xff]  ;;  %p772_p6 = scmp.ne.s32.totalorder %s1101_s27, %s771_s8  ;;  %p1174_p11 = scmp.ne.s32.totalorder %s1164_s29, 0 }
  0x7a   : > { %v294_v10 = vld [vmem:[%s1083_s12 + $0x10] sm:$0xff]  ;;  %v566_v13 = vld [vmem:[%s1152_s3] ss:$0 sm:$0xff]  ;;  %v295_v14 = vld [vmem:[%s1083_s12 + $0x18] sm:$0xff]  ;;  %s854_s25 = smov [#allocation8]  }
  0x7b   : > { %v293_v17 = vld [vmem:[%s1083_s12 + $0x8] sm:$0xff]  ;;  %p773_p2 = pnand %p772_p6, %p1174_p11  ;;  %s775_s26 = sshll.u32 %s854_s25, 4  ;;  %s776_s26 = int_to_ptr.vmem [resolvable:$false] %s775_s26 }
  0x7c   : > { %588 = vmatpush3.bf16.msra.mxu0 %v674_v1  ;;  %s777_s28 = scalar_lea.vmem %s776_s26, 1024  ;;  %p778_p0 = scmp.lt.s32.totalorder %s1101_s27, %s776_s26 }
  0x7d   : > { %589 = vmatprep.subr.bf16.mxu0 %v675_v2  ;;  %p774_p5 = pneg %p773_p2  ;;  %p779_p9 = scmp.lt.s32.totalorder %s777_s28, %s771_s8 }
  0x7f   : > { %p780_p1 = por %p779_p9, %p778_p0 }
  0x80   : > { %590 = vmatpush3.bf16.msra.mxu0 %v675_v2 }
  0x81   : > { %591 = vmatprep.subr.bf16.mxu0 %v676_v3  ;;  %p781_p3 = pnand %p780_p1, %p774_p5 }
  0x84   : > { %592 = vmatpush3.bf16.msra.mxu0 %v676_v3 }
  0x85   : > { %593 = vmatprep.subr.bf16.mxu0 %v677_v5 }
  0x88   : > { %594 = vmatpush3.bf16.msra.mxu0 %v677_v5 }
  0x89   : > { %595 = vmatprep.subr.bf16.mxu0 %v678_v6 }
  0x8c   : > { %596 = vmatpush3.bf16.msra.mxu0 %v678_v6 }
  0x8d   : > { %597 = vmatprep.subr.bf16.mxu0 %v679_v7 }
  0x90   : > { %598 = vmatpush3.bf16.msra.mxu0 %v679_v7 }
  0x91   : > { %599 = vmatprep.subr.bf16.mxu0 %v680_v8 }
  0x94   : > { %600 = vmatpush3.bf16.msra.mxu0 %v680_v8 }
  0x97   : > { %602 = vmatmul.mubr.bf16.vlgmr.msra.gmra.mrb[0].mxu0 %v682_v9 }
 0x16a   : > { %v603_v12 = vpop.f32.mrb[0].mxu0 }
 0x16b   : > { %v399_v15 = vadd.f32 %v603_v12, %v294_v10  ;;  %v390_v16 = vpop.f32.mrb[1].mxu0 }
 0x16c   : > { %v391_v18 = vadd.f32 %v390_v16, %v292_v11  ;;  %v604_v19 = vpop.f32.mrb[2].mxu0 }
 0x16d   : > { %v414_v20 = vadd.f32 %v566_v13, %v399_v15  ;;  %v402_v21 = vadd.f32 %v604_v19, %v295_v14  ;;  %v393_v22 = vpop.f32.mrb[3].mxu0 }
 0x16e   : > { %v412_v23 = vadd.f32 %v566_v13, %v391_v18  ;;  %v394_v24 = vadd.f32 %v393_v22, %v293_v17 }
 0x16f   : > { %v418_v25 = vmax.f32 %v414_v20, 0.0  ;;  %v415_v26 = vadd.f32 %v566_v13, %v402_v21 }
 0x170   : > { %v416_v27 = vmax.f32 %v412_v23, 0.0  ;;  %v413_v28 = vadd.f32 %v566_v13, %v394_v24 }
 0x171   : > { %422 = vst [vmem:[%s267_s14 + $0x10] sm:$0xff] %v418_v25  ;;  %v419_v29 = vmax.f32 %v415_v26, 0.0 }
 0x172   : > { %420 = vst [vmem:[%s267_s14] sm:$0xff] %v416_v27  ;;  %v417_v30 = vmax.f32 %v413_v28, 0.0 }
 0x173   : > { %423 = vst [vmem:[%s267_s14 + $0x18] sm:$0xff] %v419_v29 }
 0x174   : > { %421 = vst [vmem:[%s267_s14 + $0x8] sm:$0xff] %v417_v30 }
 0x175   : > { %784 = shalt.err (!%p781_p3)
}
 0x176   : > { %s785_s13 = scalar_lea.hbm %s1106_s0, 512  ;;  %s789_s7 = scalar_lea.hbm %s1153_s4, 2048 }
 0x177   : > { %p786_p10 = scmp.ne.s32.totalorder %s1106_s0, %s785_s13  ;;  %p790_p13 = scmp.lt.u32.totalorder %s1106_s0, %s1153_s4 }
 0x178   : > { %p791_p12 = scmp.lt.u32.totalorder %s789_s7, %s785_s13  ;;  %p793_p6 = scmp.lt.u32.totalorder %s785_s13, %s1106_s0 }
 0x179   : > { %p787_p8 = pnand %p786_p10, %p1174_p11 }
 0x17a   : > { %p792_p4 = por %p791_p12, %p790_p13 }
 0x17b   : > { %p788_p7 = pneg %p787_p8 }
 0x17c   : > { %p794_p2 = por %p793_p6, %p792_p4 }
 0x17e   : > { %p795_p5 = pnand %p794_p2, %p788_p7 }
 0x180   : > { %798 = shalt.err (!%p795_p5)
}
 0x181   : > { %s855_s11 = smov 128   ;;  %s856_s14 = smov 8  }
 0x182   : > { %613 = dma.vmem_to_hbm [thread:$0]  (%p1174_p11), %s1101_s27, 512, %s1106_s0, %s425_s30, %s855_s11, %s855_s11, %s856_s14  }
 0x183 PF: > { %p633_p0 = scmp.ge.s32.totalorder %s845_s18, 2  ;;  %s453_s20 = sand.u32 1, %s833_s15  }
 0x184   : > { %p1175_p9 = scmp.ne.s32.totalorder %s1165_s5, 0  ;;  %s454_s9 = scalar_lea.sflag [#allocation4], %s453_s20 }
 0x186   : > { %p627_p1 = pnand %p633_p0, %p1175_p9 }
 0x188   : > { %828 = dma.done.wait (!%p627_p1), %s454_s9, 512  }
 0x189   : > { %830 = vsyncadd (!%p627_p1), %s454_s9, 4294966784  ;;  %p18_p3 = scmp.ge.s32.totalorder %s903_s19, 6   ;;  %s1176_s15 = smov %s837_s16 }
 0x18a   : > { %s1177_s16 = smov %s841_s17  ;;  %s1178_s17 = smov %s912_s22 }
 0x18b   : > { %s1179_s18 = smov %s903_s19  ;;  %20 = sbr.rel (!%p18_p3) target bundleno = 8 (0x8), region = 96 }
 0x192   :  { %459 = vsyncpa [#allocation3], 1 }
 0x193   :  { %461 = vsyncpa [#allocation3 + $0x1], 1 }
 0x194   :  { %462 = vsyncpa [#allocation6], 1 }
 0x195   :  { %463 = vsyncpa [#allocation4], 1 }
 0x196   :  { %465 = vsyncpa [#allocation4 + $0x1], 1 }

</bundles_post_ra>
